<compile_context>
chip_gen: v7x
topology: tpu7x:2x2x1
jax: 0.10.0
libtpu: 0.0.40
codegen_flags: <defaults>
</compile_context>

<pallas_src>
import functools

import jax
import jax.numpy as jnp
from jax.experimental import pallas as pl
from jax.experimental.pallas import tpu as pltpu

# Problem sizes (small, consistent with the module: dim divisible by num_heads).
B = 2          # batch
N = 8          # tokens (incl. class token at index 0)
C = 32         # dim
NUM_HEADS = 8
HEAD_DIM = C // NUM_HEADS
SCALE = HEAD_DIM ** (-0.5)


def class_attn_kernel(x_ref, wqkv_ref, wp_ref, bp_ref, o_ref):
    """Whole batch in one grid step.

    x_ref:    (B, N, C)   input tokens
    wqkv_ref: (C, 3C)     fused [Wq | Wk | Wv] (in, out layout)
    wp_ref:   (C, C)      output projection weight (in, out layout)
    bp_ref:   (1, C)      output projection bias
    o_ref:    (B, 1, C)   class-attention output
    """
    x = x_ref[...].astype(jnp.float32)                              # (B, N, C)

    # --- One fused QKV matmul on the flattened token matrix (single MXU push).
    x2 = x.reshape(B * N, C)                                        # (B*N, C)
    qkv = jnp.dot(x2, wqkv_ref[...], preferred_element_type=jnp.float32)  # (B*N, 3C)
    qkv3 = qkv.reshape(B, N, 3 * C)                                 # (B, N, 3C)

    q_cls = qkv3[:, 0, 0:C]                                         # (B, C): q from class token only
    k = qkv3[:, :, C:2 * C]                                         # (B, N, C)
    v = qkv3[:, :, 2 * C:3 * C]                                     # (B, N, C)

    # --- Head block mask (H, C): mask[h, c] = 1 iff channel c belongs to head h.
    # Built with iota + compares (no integer divide needed).
    h_row = jax.lax.broadcasted_iota(jnp.int32, (NUM_HEADS, C), 0)   # head id per row
    c_idx = jax.lax.broadcasted_iota(jnp.int32, (NUM_HEADS, C), 1)   # channel id per col
    lo = h_row * HEAD_DIM
    head_mask = ((c_idx >= lo) & (c_idx < lo + HEAD_DIM)).astype(jnp.float32)  # (H, C)

    # --- Scores for all batches and heads in ONE batched matmul:
    #   S[b, h, n] = sum_c (q_cls[b, c] * mask[h, c]) * k[b, n, c]
    q_heads = q_cls[:, None, :] * head_mask[None, :, :]              # (B, H, C)
    s = jnp.einsum('bhc,bnc->bhn', q_heads, k,
                   preferred_element_type=jnp.float32) * SCALE       # (B, H, N)

    # --- Single stable softmax over tokens for the whole (B, H, N) tile.
    s = s - jnp.max(s, axis=-1, keepdims=True)
    p = jnp.exp(s)
    l = jnp.sum(p, axis=-1, keepdims=True)                           # (B, H, 1)
    # approx=False keeps the result within 1e-5 of the f32 reference; flip to
    # approx=True (EUP vrcp) when bf16-level accuracy is acceptable.
    p = p * pl.reciprocal(l, approx=False)                           # (B, H, N)

    # --- P @ V batched over B, then pick each head's own channel block.
    o_heads = jnp.einsum('bhn,bnc->bhc', p, v,
                         preferred_element_type=jnp.float32)         # (B, H, C)
    o_cls = jnp.sum(o_heads * head_mask[None, :, :], axis=1)         # (B, C)

    # --- Single full-width output projection + bias.
    y = jnp.dot(o_cls, wp_ref[...], preferred_element_type=jnp.float32) + bp_ref[...]
    o_ref[...] = y.reshape(B, 1, C).astype(o_ref.dtype)
    # TODO(synk): attn_drop / proj_drop are identity in eval mode; dropout not implemented.


@functools.partial(jax.jit, static_argnames=())
def class_attn(x, wq, wk, wv, wp, bp):
    assert x.shape == (B, N, C)
    w_qkv = jnp.concatenate([wq, wk, wv], axis=1)    # (C, 3C), fused outside the kernel
    bp2 = bp.reshape(1, C)
    return pl.pallas_call(
        class_attn_kernel,
        out_shape=jax.ShapeDtypeStruct((B, 1, C), x.dtype),
        grid_spec=pltpu.PrefetchScalarGridSpec(
            num_scalar_prefetch=0,
            grid=(1,),                                            # whole problem in one step
            in_specs=[
                pl.BlockSpec((B, N, C), lambda i: (0, 0, 0)),     # x, full batch
                pl.BlockSpec((C, 3 * C), lambda i: (0, 0)),       # fused W_qkv
                pl.BlockSpec((C, C), lambda i: (0, 0)),           # Wp (proj)
                pl.BlockSpec((1, C), lambda i: (0, 0)),           # proj bias
            ],
            out_specs=pl.BlockSpec((B, 1, C), lambda i: (0, 0, 0)),
        ),
        compiler_params=pltpu.CompilerParams(
            dimension_semantics=("arbitrary",)),
    )(x, w_qkv, wp, bp2)


def class_attn_reference(x, wq, wk, wv, wp, bp):
    """Pure-JAX reference mirroring the PyTorch forward."""
    q = (x[:, 0] @ wq).reshape(B, 1, NUM_HEADS, HEAD_DIM).transpose(0, 2, 1, 3)
    k = (x @ wk).reshape(B, N, NUM_HEADS, HEAD_DIM).transpose(0, 2, 1, 3)
    v = (x @ wv).reshape(B, N, NUM_HEADS, HEAD_DIM).transpose(0, 2, 1, 3)
    attn = jax.nn.softmax((q * SCALE) @ jnp.swapaxes(k, -2, -1), axis=-1)
    x_cls = (attn @ v).transpose(0, 2, 1, 3).reshape(B, 1, C)
    return x_cls @ wp + bp


if __name__ == "__main__":
    key = jax.random.PRNGKey(0)
    kx, kq, kk, kv, kp, kb = jax.random.split(key, 6)

    x = jax.random.normal(kx, (B, N, C), dtype=jnp.float32)
    # Deterministic synthetic parameters (shapes per nn.Linear(dim, dim)).
    wq = jax.random.normal(kq, (C, C), dtype=jnp.float32) * 0.05
    wk = jax.random.normal(kk, (C, C), dtype=jnp.float32) * 0.05
    wv = jax.random.normal(kv, (C, C), dtype=jnp.float32) * 0.05
    wp = jax.random.normal(kp, (C, C), dtype=jnp.float32) * 0.05
    bp = jax.random.normal(kb, (C,), dtype=jnp.float32) * 0.05

    out = class_attn(x, wq, wk, wv, wp, bp)
    out = jax.block_until_ready(out)

    ref = class_attn_reference(x, wq, wk, wv, wp, bp)
    assert out.shape == (B, 1, C)
    assert jnp.allclose(out, ref, atol=1e-5, rtol=1e-5), "mismatch vs reference"

    print("KERNEL_OK")
</pallas_src>

<mosaic_0001>
module attributes {stable_mosaic.version = 11 : i64} {
  func.func @class_attn_kernel(%arg0: i32, %arg1: memref<2x8x32xf32, #tpu.memory_space<vmem>>, %arg2: memref<32x96xf32, #tpu.memory_space<vmem>>, %arg3: memref<32x32xf32, #tpu.memory_space<vmem>>, %arg4: memref<1x32xf32, #tpu.memory_space<vmem>>, %arg5: memref<2x1x32xf32, #tpu.memory_space<vmem>>) attributes {dimension_semantics = [#tpu.dimension_semantics<arbitrary>], iteration_bounds = array<i64: 1>, scalar_prefetch = 0 : i64, scratch_operands = 0 : i64, tpu.core_type = #tpu.core_type<tc>, window_params = [{pipeline_mode = #tpu.pipeline_mode<synchronous>, transform_indices = @transform_0, window_bounds = array<i64: 2, 8, 32>}, {pipeline_mode = #tpu.pipeline_mode<synchronous>, transform_indices = @transform_1, window_bounds = array<i64: 32, 96>}, {pipeline_mode = #tpu.pipeline_mode<synchronous>, transform_indices = @transform_2, window_bounds = array<i64: 32, 32>}, {pipeline_mode = #tpu.pipeline_mode<synchronous>, transform_indices = @transform_3, window_bounds = array<i64: 1, 32>}, {pipeline_mode = #tpu.pipeline_mode<synchronous>, transform_indices = @transform_4, window_bounds = array<i64: 2, 1, 32>}]} {
    %c0 = arith.constant 0 : index
    %c0_0 = arith.constant 0 : index
    %c0_1 = arith.constant 0 : index
    %0 = vector.load %arg1[%c0, %c0_0, %c0_1] : memref<2x8x32xf32, #tpu.memory_space<vmem>>, vector<2x8x32xf32>
    %1 = vector.shape_cast %0 : vector<2x8x32xf32> to vector<16x32xf32>
    %c0_2 = arith.constant 0 : index
    %c0_3 = arith.constant 0 : index
    %2 = vector.load %arg2[%c0_2, %c0_3] : memref<32x96xf32, #tpu.memory_space<vmem>>, vector<32x96xf32>
    %cst = arith.constant dense<0.000000e+00> : vector<16x96xf32>
    %3 = tpu.matmul %1, %2, %cst {dimension_numbers = #tpu.dot_dimension_numbers<[1], [0], [0], [1], [0, 0, 1, 1], [], []>} : vector<16x32xf32>, vector<32x96xf32>, vector<16x96xf32> -> vector<16x96xf32>
    %4 = vector.shape_cast %3 : vector<16x96xf32> to vector<2x8x96xf32>
    %5 = vector.extract_strided_slice %4 {offsets = [0, 0, 0], sizes = [2, 1, 32], strides = [1, 1, 1]} : vector<2x8x96xf32> to vector<2x1x32xf32>
    %6 = vector.shape_cast %5 : vector<2x1x32xf32> to vector<2x32xf32>
    %7 = vector.extract_strided_slice %4 {offsets = [0, 0, 32], sizes = [2, 8, 32], strides = [1, 1, 1]} : vector<2x8x96xf32> to vector<2x8x32xf32>
    %8 = vector.extract_strided_slice %4 {offsets = [0, 0, 64], sizes = [2, 8, 32], strides = [1, 1, 1]} : vector<2x8x96xf32> to vector<2x8x32xf32>
    %9 = tpu.iota {dimensions = array<i32: 0>} : vector<8x32xi32>
    %10 = tpu.iota {dimensions = array<i32: 1>} : vector<8x32xi32>
    %c4_i32 = arith.constant 4 : i32
    %11 = vector.broadcast %c4_i32 : i32 to vector<8x32xi32>
    %12 = arith.muli %9, %11 : vector<8x32xi32>
    %13 = arith.cmpi sge, %10, %12 : vector<8x32xi32>
    %c4_i32_4 = arith.constant 4 : i32
    %14 = vector.broadcast %c4_i32_4 : i32 to vector<8x32xi32>
    %15 = arith.addi %12, %14 : vector<8x32xi32>
    %16 = arith.cmpi slt, %10, %15 : vector<8x32xi32>
    %17 = arith.andi %13, %16 : vector<8x32xi1>
    %18 = arith.extui %17 : vector<8x32xi1> to vector<8x32xi32>
    %19 = arith.sitofp %18 : vector<8x32xi32> to vector<8x32xf32>
    %20 = vector.shape_cast %6 : vector<2x32xf32> to vector<2x1x32xf32>
    %21 = vector.shape_cast %19 : vector<8x32xf32> to vector<1x8x32xf32>
    %22 = vector.broadcast %20 : vector<2x1x32xf32> to vector<2x8x32xf32>
    %23 = vector.broadcast %21 : vector<1x8x32xf32> to vector<2x8x32xf32>
    %24 = arith.mulf %22, %23 : vector<2x8x32xf32>
    "tpu.trace_start"() <{level = 10 : i32, message = "bhc,bnc->bhn"}> : () -> ()
    %cst_5 = arith.constant dense<0.000000e+00> : vector<2x8x8xf32>
    %25 = tpu.matmul %24, %7, %cst_5 {dimension_numbers = #tpu.dot_dimension_numbers<[2], [2], [1], [1], [0, 0, 0, 1, 1, 1], [0], [0]>} : vector<2x8x32xf32>, vector<2x8x32xf32>, vector<2x8x8xf32> -> vector<2x8x8xf32>
    "tpu.trace_stop"() : () -> ()
    %cst_6 = arith.constant 5.000000e-01 : f32
    %26 = vector.broadcast %cst_6 : f32 to vector<2x8x8xf32>
    %27 = arith.mulf %25, %26 : vector<2x8x8xf32>
    %cst_7 = arith.constant dense<0xFF800000> : vector<2x8xf32>
    %28 = vector.multi_reduction <maximumf>, %27, %cst_7 [2] : vector<2x8x8xf32> to vector<2x8xf32>
    %29 = vector.shape_cast %28 : vector<2x8xf32> to vector<2x8x1xf32>
    %30 = vector.broadcast %29 : vector<2x8x1xf32> to vector<2x8x8xf32>
    %31 = arith.subf %27, %30 : vector<2x8x8xf32>
    %32 = math.exp %31 : vector<2x8x8xf32>
    %cst_8 = arith.constant dense<0.000000e+00> : vector<2x8xf32>
    %33 = vector.multi_reduction <add>, %32, %cst_8 [2] : vector<2x8x8xf32> to vector<2x8xf32>
    %34 = vector.shape_cast %33 : vector<2x8xf32> to vector<2x8x1xf32>
    %35 = tpu.reciprocal %34 : vector<2x8x1xf32> -> vector<2x8x1xf32>
    %36 = vector.broadcast %35 : vector<2x8x1xf32> to vector<2x8x8xf32>
    %37 = arith.mulf %32, %36 : vector<2x8x8xf32>
    "tpu.trace_start"() <{level = 10 : i32, message = "bhn,bnc->bhc"}> : () -> ()
    %cst_9 = arith.constant dense<0.000000e+00> : vector<2x8x32xf32>
    %38 = tpu.matmul %37, %8, %cst_9 {dimension_numbers = #tpu.dot_dimension_numbers<[2], [1], [1], [2], [0, 0, 0, 1, 1, 2], [0], [0]>} : vector<2x8x8xf32>, vector<2x8x32xf32>, vector<2x8x32xf32> -> vector<2x8x32xf32>
    "tpu.trace_stop"() : () -> ()
    %39 = vector.shape_cast %19 : vector<8x32xf32> to vector<1x8x32xf32>
    %40 = vector.broadcast %39 : vector<1x8x32xf32> to vector<2x8x32xf32>
    %41 = arith.mulf %38, %40 : vector<2x8x32xf32>
    %cst_10 = arith.constant dense<0.000000e+00> : vector<2x32xf32>
    %42 = vector.multi_reduction <add>, %41, %cst_10 [1] : vector<2x8x32xf32> to vector<2x32xf32>
    %c0_11 = arith.constant 0 : index
    %c0_12 = arith.constant 0 : index
    %43 = vector.load %arg3[%c0_11, %c0_12] : memref<32x32xf32, #tpu.memory_space<vmem>>, vector<32x32xf32>
    %cst_13 = arith.constant dense<0.000000e+00> : vector<2x32xf32>
    %44 = tpu.matmul %42, %43, %cst_13 {dimension_numbers = #tpu.dot_dimension_numbers<[1], [0], [0], [1], [0, 0, 1, 1], [], []>} : vector<2x32xf32>, vector<32x32xf32>, vector<2x32xf32> -> vector<2x32xf32>
    %c0_14 = arith.constant 0 : index
    %c0_15 = arith.constant 0 : index
    %45 = vector.load %arg4[%c0_14, %c0_15] : memref<1x32xf32, #tpu.memory_space<vmem>>, vector<1x32xf32>
    %46 = vector.broadcast %45 : vector<1x32xf32> to vector<2x32xf32>
    %47 = arith.addf %44, %46 : vector<2x32xf32>
    %48 = vector.shape_cast %47 : vector<2x32xf32> to vector<2x1x32xf32>
    %c0_16 = arith.constant 0 : index
    %c0_17 = arith.constant 0 : index
    %c0_18 = arith.constant 0 : index
    %49 = vector.load %arg5[%c0_16, %c0_17, %c0_18] : memref<2x1x32xf32, #tpu.memory_space<vmem>>, vector<2x1x32xf32>
    tpu.vector_store %arg5[%c0_16, %c0_17, %c0_18], %48 {strides = array<i32>} : memref<2x1x32xf32, #tpu.memory_space<vmem>>, vector<2x1x32xf32>,
    return
  }
  func.func @transform_0(%arg0: i32) -> (i32, i32, i32) {
    %c0_i32 = arith.constant 0 : i32
    %c0_i32_0 = arith.constant 0 : i32
    %c0_i32_1 = arith.constant 0 : i32
    %c0_i32_2 = arith.constant 0 : i32
    return %c0_i32, %c0_i32_0, %c0_i32_1 : i32, i32, i32
  }
  func.func @transform_1(%arg0: i32) -> (i32, i32) {
    %c0_i32 = arith.constant 0 : i32
    %c0_i32_0 = arith.constant 0 : i32
    %c0_i32_1 = arith.constant 0 : i32
    return %c0_i32, %c0_i32_0 : i32, i32
  }
  func.func @transform_2(%arg0: i32) -> (i32, i32) {
    %c0_i32 = arith.constant 0 : i32
    %c0_i32_0 = arith.constant 0 : i32
    %c0_i32_1 = arith.constant 0 : i32
    return %c0_i32, %c0_i32_0 : i32, i32
  }
  func.func @transform_3(%arg0: i32) -> (i32, i32) {
    %c0_i32 = arith.constant 0 : i32
    %c0_i32_0 = arith.constant 0 : i32
    %c0_i32_1 = arith.constant 0 : i32
    return %c0_i32, %c0_i32_0 : i32, i32
  }
  func.func @transform_4(%arg0: i32) -> (i32, i32, i32) {
    %c0_i32 = arith.constant 0 : i32
    %c0_i32_0 = arith.constant 0 : i32
    %c0_i32_1 = arith.constant 0 : i32
    %c0_i32_2 = arith.constant 0 : i32
    return %c0_i32, %c0_i32_0, %c0_i32_1 : i32, i32, i32
  }
}

</mosaic_0001>

<bundles_post_ra>
// kernel: class_attn.1
= control target key start
LH: loop header
LB: loop body
LE: loop exit
PB: predicated region body
PF: predicated region fallthrough
CT: control target
= control target key end

     0   :  { %vm24_vm0 = vcmask 261120   ;;  %s854_s0 = inlined_call_operand.vmem [shape: f32[2,8,32], index: 0, kind: input, shape index: {}]   ;;  %s855_s1 = inlined_call_operand.vmem [shape: f32[32,96], index: 1, kind: input, shape index: {}]   ;;  %s856_s2 = inlined_call_operand.vmem [shape: f32[32,32], index: 2, kind: input, shape index: {}]   ;;  %s857_s3 = inlined_call_operand.vmem [shape: f32[1,32], index: 3, kind: input, shape index: {}]   ;;  %s858_s4 = inlined_call_operand.hbm [shape: f32[2,1,32], index: 4, kind: output, shape index: {}]  }
   0x1   :  { %v20_v0 = vld [vmem:[%s855_s1] sm:$0xff]  ;;  %v21_v1 = vld [vmem:[%s855_s1 + $0x8] sm:$0xff]  ;;  %v22_v2 = vld [vmem:[%s855_s1 + $0x10] sm:$0xff] }
   0x2   :  { %v679_v3 = vpack.c.bf16 %v21_v1, %v20_v0  ;;  %v23_v4 = vld [vmem:[%s855_s1 + $0x18] sm:$0xff]  ;;  %v18_v5 = vld [vmem:[%s854_s0] sm:$0xff] }
   0x3   :  { %v683_v6 = vpack.c.bf16 %v23_v4, %v22_v2  ;;  %645 = vmatprep.mubr.msk.f32.mxu0 %vm24_vm0, %v18_v5 }
   0x4   :  { %9 = vsyncpa [#allocation3], 0  ;;  %680 = vmatprep.subr.bf16.mxu0 %v679_v3  ;;  %v19_v7 = vld [vmem:[%s854_s0 + $0x8] sm:$0xff]  ;;  %v734_v8 = vmov 0.0   ;;  %vm735_vm1 = vmmov 0   ;;  %s736_s1 = smov 96   ;;  %v106_v11 = vlaneseq }
   0x5   :  { %682 = vmatpush3.bf16.msra.mxu0 %v679_v3  ;;  %648 = vmatprep.subr.mxu1 %v734_v8  ;;  %vm285_vm5 = vcmask 64512   ;;  %s737_s0 = smov 64   ;;  %v476_v50 = vld [vmem:[%s856_s2] sm:$0xff]  ;;  %v477_v51 = vld [vmem:[%s856_s2 + $0x8] sm:$0xff]  ;;  %v738_v53 = vmov 0.0|0.0   ;;  %v478_v54 = vld [vmem:[%s856_s2 + $0x10] sm:$0xff] }
   0x6   :  { %684 = vmatprep.subr.bf16.mxu0 %v683_v6  ;;  %650 = vmatprep.mubr.msk.f32.mxu1 %vm735_vm1, %v734_v8  ;;  %v793_v12 = vshrl.u32 %v106_v11, 7  ;;  %v109_v14 = vand.u32 127, %v106_v11  ;;  %v688_v52 = vpack.c.bf16 %v477_v51, %v476_v50  ;;  %v479_v55 = vld [vmem:[%s856_s2 + $0x18] sm:$0xff]  ;;  %vm489_vm6 = vcmask 1041409   ;;  %s740_s10 = smov [#allocation2]  }
   0x7   :  { %v691_v56 = vpack.c.bf16 %v479_v55, %v478_v54  ;;  %vm588_vm7 = vcmask 253952   ;;  %s596_s11 = sshll.u32 %s740_s10, 4  ;;  %s597_s11 = int_to_ptr.vmem [resolvable:$true] %s596_s11 }
   0x8   :  { %v110_v13 = vmul.u32 4, %v793_v12  ;;  %v119_v16 = vsub.s32 0, %v793_v12  ;;  %s710_s12 = scalar_lea.vmem %s597_s11, 32  ;;  %p715_p1 = scmp.lt.s32.totalorder %s597_s11, %s597_s11 }
   0x9   :  { %686 = vmatpush3.bf16.msra.mxu0 %v683_v6  ;;  %p711_p0 = scmp.ne.s32.totalorder %s597_s11, %s710_s12  ;;  %p716_p2 = scmp.lt.s32.totalorder %s710_s12, %s710_s12 }
   0xa   :  { %v112_v15 = vadd.s32 4, %v110_v13  ;;  %vm111_vm2 = vcmp.ge.s32.totalorder %v109_v14, %v110_v13  ;;  %687 = vmatprep.subr.bf16.mxu0 %v738_v53 }
   0xb   :  { %p717_p3 = por %p716_p2, %p715_p1 }
   0xc   :  { %646 = vmatmul.mubr.msk.f32.vlgmr.msra.gmra.mrb[0].mxu0 %vm24_vm0, %v19_v7  ;;  %vm113_vm3 = vcmp.lt.s32.totalorder %v109_v14, %v112_v15  ;;  %v739_v15 = vmov 1966171168  }
   0xd   :  { %676 = vmatprep.mubr.msk.f32.mxu0 %vm735_vm1, %v734_v8  ;;  %vm114_vm4 = vmand %vm111_vm2, %vm113_vm3  ;;  %689 = vmatpush3.bf16.msra.mxu0 %v688_v52  ;;  %p718_p4 = pnand %p717_p3, %p711_p0 }
   0xe   :  { %v798_v18 = vsel %vm114_vm4, 1.0, %v734_v8  ;;  %690 = vmatprep.subr.bf16.mxu0 %v738_v53 }
  0x11   :  { %692 = vmatpush3.bf16.msra.mxu0 %v691_v56 }
  0xdf   :  { %v647_v9 = vpop.f32.mrb[0].mxu0 }
  0xe0   :  { %v97_v10 = vpop.f32.mrb[1].mxu0  ;;  %v124_v20 = vrot.slane %v647_v9, %v119_v16 }
  0xe1   :  { %128 = vrot.lane.b32.xlu0 %v97_v10, %s736_s1  ;;  %v120_v17 = vrot.slane %v97_v10, %v119_v16  ;;  %v565_v16 = vunpack.c.l.s4 %v739_v15 }
  0xe2   :  { %v126_v23 = vmul.f32 %v798_v18, %v124_v20 }
  0xe3   :  { %v125_v21 = vmul.f32 %v798_v18, %v120_v17  ;;  %v566_v17 = vunpack.c.0.s8 %v565_v16 }
  0xe5   :  { %206 = vrot.lane.b32.xlu0 %v647_v9, %s736_s1 }
 0x153   :  { %v129_v19 = vpop.permute.xlu0 %128 }
 0x154   :  { %649 = vmatpush3.xpose.msk.msra.mxu1 %vm24_vm0, %v129_v19  ;;  %v569_v19 = vsub.s32 %v566_v17, %v793_v12 }
 0x155   :  { %653 = vmatprep.subr.mxu1 %v734_v8 }
 0x157   :  { %v207_v22 = vpop.permute.xlu0 %206  ;;  %651 = vmatmul.mubr.msk.f32.vlgmr.msra.gmra.mrb[0].mxu1 %vm24_vm0, %v125_v21 }
 0x158   :  { %654 = vmatpush3.xpose.msk.msra.mxu1 %vm24_vm0, %v207_v22  ;;  %655 = vmatprep.mubr.msk.f32.mxu1 %vm735_vm1, %v734_v8 }
 0x159   :  { %658 = vmatprep.subr.mxu1 %v734_v8 }
 0x15b   :  { %656 = vmatmul.mubr.msk.f32.vlgmr.msra.gmra.mrb[2].mxu1 %vm24_vm0, %v126_v23 }
 0x15c   :  { %660 = vmatprep.mubr.msk.f32.mxu1 %vm735_vm1, %v734_v8 }
 0x22a   :  { %v201_v24 = vpop.f32.mrb[0].mxu1 }
 0x22b   :  { %v283_v25 = vmul.f32 0.5, %v201_v24  ;;  %v652_v26 = vpop.f32.mrb[1].mxu1 }
 0x22d   :  { %v286_v27 = vsel %vm285_vm5, %v283_v25, -inf }
 0x22e   :  { %287 = vmax.xlane.f32.xlu1 %v286_v27  ;;  %v279_v28 = vpop.f32.mrb[2].mxu1 }
 0x22f   :  { %v284_v29 = vmul.f32 0.5, %v279_v28  ;;  %v657_v30 = vpop.f32.mrb[3].mxu1 }
 0x231   :  { %v289_v31 = vsel %vm285_vm5, %v284_v29, -inf }
 0x232   :  { %290 = vmax.xlane.f32.xlu1 %v289_v31 }
 0x243   :  { %308 = vrot.lane.b32.xlu1 %v97_v10, %s737_s0 }
 0x2bb   :  { %v288_v32 = vpop.xlane.xlu1 %287 }
 0x2bc   :  { %v292_v33 = vsub.f32 %v283_v25, %v288_v32 }
 0x2be   :  { %v294_v34 = vmul.f32 1.442695, %v292_v33 }
 0x2bf   :  { %v291_v35 = vpop.xlane.xlu1 %290 }
 0x2c0   :  { %702 = vpow2.f32 %v294_v34  ;;  %v293_v36 = vsub.f32 %v284_v29, %v291_v35 }
 0x2c2   :  { %v296_v37 = vmul.f32 1.442695, %v293_v36 }
 0x2c3   :  { %v309_v38 = vpop.permute.xlu1 %308 }
 0x2c4   :  { %704 = vpow2.f32 %v296_v37  ;;  %659 = vmatpush3.msra.mxu1 %v309_v38 }
 0x2c5   :  { %663 = vmatprep.subr.mxu1 %v734_v8 }
 0x2ca   :  { %v703_v39 = vpop.eup %702 }
 0x2cb   :  { %v298_v40 = vsel %vm285_vm5, %v703_v39, 0.0 }
 0x2cc   :  { %299 = vadd.xlane.f32.xlu0 %v298_v40 }
 0x2ce   :  { %v705_v41 = vpop.eup %704 }
 0x2cf   :  { %v301_v42 = vsel %vm285_vm5, %v705_v41, 0.0 }
 0x2d0   :  { %302 = vadd.xlane.f32.xlu1 %v301_v42 }
 0x2e1   :  { %384 = vrot.lane.b32.xlu1 %v647_v9, %s737_s0 }
 0x359   :  { %v300_v43 = vpop.xlane.xlu0 %299 }
 0x35a   :  { %706 = vrcp.f32 %v300_v43 }
 0x35d   :  { %v303_v44 = vpop.xlane.xlu1 %302 }
 0x35e   :  { %708 = vrcp.f32 %v303_v44 }
 0x361   :  { %v385_v47 = vpop.permute.xlu1 %384 }
 0x364   :  { %v707_v45 = vpop.eup %706 }
 0x365   :  { %v306_v46 = vmul.f32 %v707_v45, %v703_v39 }
 0x367   :  { %661 = vmatmul.mubr.msk.f32.vlgmr.msra.gmra.mrb[4].mxu1 %vm285_vm5, %v306_v46 }
 0x368   :  { %v709_v48 = vpop.eup %708  ;;  %664 = vmatpush3.msra.mxu1 %v385_v47  ;;  %665 = vmatprep.mubr.msk.f32.mxu1 %vm735_vm1, %v734_v8 }
 0x369   :  { %v307_v49 = vmul.f32 %v709_v48, %v705_v41 }
 0x36b   :  { %666 = vmatmul.mubr.msk.f32.vlgmr.msra.gmra.mrb[6].mxu1 %vm285_vm5, %v307_v49 }
 0x43a   :  { %v380_v57 = vpop.f32.mrb[4].mxu1 }
 0x43b   :  { %v460_v58 = vmul.f32 %v798_v18, %v380_v57  ;;  %v662_v59 = vpop.f32.mrb[5].mxu1 }
 0x43d   :  { %v462_v60 = vsel %vm24_vm0, %v460_v58, 0.0 }
 0x43e   :  { %v463_v61 = vrot.slane %v462_v60, 4  ;;  %v456_v62 = vpop.f32.mrb[6].mxu1 }
 0x43f   :  { %v461_v63 = vmul.f32 %v798_v18, %v456_v62  ;;  %v667_v0 = vpop.f32.mrb[7].mxu1  ;;  %v616_v18 = vld [vmem:[%s857_s3] ss:$0 sm:$0xff] }
 0x440   :  { %v464_v1 = vadd.f32 %v463_v61, %v462_v60 }
 0x441   :  { %v469_v2 = vsel %vm24_vm0, %v461_v63, 0.0 }
 0x442   :  { %v465_v3 = vrot.slane %v464_v1, 2  ;;  %v470_v4 = vrot.slane %v469_v2, 4 }
 0x444   :  { %v466_v5 = vadd.f32 %v465_v3, %v464_v1  ;;  %v471_v6 = vadd.f32 %v470_v4, %v469_v2 }
 0x446   :  { %v472_v7 = vrot.slane %v471_v6, 2  ;;  %v467_v8 = vrot.slane %v466_v5, 1 }
 0x448   :  { %v473_v9 = vadd.f32 %v472_v7, %v471_v6  ;;  %v468_v11 = vadd.f32 %v467_v8, %v466_v5 }
 0x44a   :  { %v474_v10 = vrot.slane %v473_v9, 1 }
 0x44c   :  { %v475_v13 = vadd.f32 %v474_v10, %v473_v9 }
 0x44e   :  { %v490_v14 = vsel %vm489_vm6, %v475_v13, %v468_v11 }
 0x44f   :  { %677 = vmatmul.mubr.msk.f32.vlgmr.msra.gmra.mrb[2].mxu0 %vm24_vm0, %v490_v14 }
 0x522   :  { %v559_v20 = vpop.f32.mrb[2].mxu0 }
 0x523   :  { %v560_v21 = vadd.f32 %v616_v18, %v559_v20  ;;  %v678_v22 = vpop.f32.mrb[3].mxu0 }
 0x525   :  { %v570_v23 = vrot.slane %v560_v21, %v569_v19 }
 0x527   :  { %v571_v24 = vcombine.high %v570_v23, %v570_v23  ;;  %v578_v25 = vrot.slane %v570_v23, %v569_v19 }
 0x529   :  { %v585_v26 = vrot.slane %v571_v24, %v569_v19  ;;  %589 = vst.msk [vmem:[#allocation2] sm:$0x1] %vm588_vm7, %v578_v25 }
 0x52b   :  { %590 = vst.msk [vmem:[#allocation2 + $0x1] sm:$0x1] %vm588_vm7, %v585_v26 }
 0x52c   :  { %721 = shalt.err (!%p718_p4)
}
 0x52d   :  { %s722_s14 = scalar_lea.hbm %s858_s4, 32 }
 0x52e   :  { %p723_p5 = scmp.ne.s32.totalorder %s858_s4, %s722_s14  ;;  %p726_p6 = scmp.lt.u32.totalorder %s722_s14, %s858_s4 }
 0x530   :  { %p728_p7 = pnand %p726_p6, %p723_p5 }
 0x532   :  { %731 = shalt.err (!%p728_p7)
}
 0x533   :  { %s741_s19 = smov 16   ;;  %s742_s20 = smov 1  }
 0x534   :  { %602 = dma.vmem_to_hbm [thread:$0]  %s597_s11, 32, %s858_s4, [#allocation3], %s741_s19, %s741_s19, %s742_s20  }
 0x535   :  { %732 = dma.done.wait [#allocation3], 32  }
 0x536   :  { %733 = vsyncadd [#allocation3], 4294967264 }
 0x537   :  { %606 = vsyncpa [#allocation3], 1 }

</bundles_post_ra>
